<compile_context>
chip_gen: v5e
topology: v5e:2x2
jax: 0.10.0
libtpu: 0.0.40
codegen_flags: <defaults>
</compile_context>

<pallas_src>
import functools
import math

import jax
import jax.numpy as jnp
import numpy as np
from jax.experimental import pallas as pl
from jax.experimental.pallas import tpu as pltpu


# ----------------------------------------------------------------------------
# generation-aware VMEM budgets (v5e/v6e: 128 MiB, v7x: 64 MiB per TensorCore)
# ----------------------------------------------------------------------------
def _vmem_capacity_bytes():
    try:
        info = pltpu.get_tpu_info()
        cap = int(getattr(info, "vmem_capacity_bytes", 0))
        if cap > 0:
            return cap
    except Exception:
        pass
    return 64 * 1024 * 1024          # conservative fallback (v7x per-TC VMEM)


_VMEM_CAP = _vmem_capacity_bytes()
VMEM_LIMIT = int(_VMEM_CAP * 0.8)    # scoped-VMEM limit handed to Mosaic
TEMP_BUDGET = _VMEM_CAP // 3         # bytes allowed for the (P, TG) k-loop temps


# ----------------------------------------------------------------------------
# glue: cartesian -> spherical (tiny, elementwise over P points; not hot path)
# ----------------------------------------------------------------------------
def to_spherical(coords):
    r = jnp.linalg.norm(coords, axis=-1, keepdims=True)                   # (B,P,1)
    sq = coords ** 2
    phi_norms = jnp.sqrt(jnp.cumsum(sq[..., ::-1], axis=-1)[..., ::-1])    # ||x[j:]||
    eps = 1e-7
    # NOTE: like the torch reference, a zero trailing norm would give 0/0 here.
    phi = jnp.arccos(jnp.clip(coords[..., :-2] / phi_norms[..., :-2],
                              -1.0 + eps, 1.0 - eps))
    a = jnp.arccos(jnp.clip(coords[..., -2:-1] / phi_norms[..., -2:-1],
                            -1.0 + eps, 1.0 - eps))
    phi_final = a + (2.0 * math.pi - 2.0 * a) * (coords[..., -1:] < 0).astype(coords.dtype)
    return jnp.transpose(r, (0, 2, 1)), jnp.concatenate([phi, phi_final], axis=-1)


# ----------------------------------------------------------------------------
# deterministic init-time constants (FreCalc.__init__ / torch_harmonics precompute)
# ----------------------------------------------------------------------------
def _make_grid_phi_major(nlat):
    # FreCalc's grid is the set {(theta_i, phi_j)} with theta_i = i*pi/nlat and
    # phi_j = (j - nlat)*pi/nlat.  We flatten it PHI-MAJOR (p = j*nlat + i) so
    # that kernel 1's lane-dense output, reshaped to (bs, nlon, nlat), is
    # already the transposed layout kernel 2's DFT matmul wants -- no XLA
    # transpose / extra HBM round-trip between the two pallas_calls.
    th = np.arange(nlat, dtype=np.float32) * math.pi / nlat               # (nlat,)
    ph = np.arange(-nlat, nlat, dtype=np.float32) * math.pi / nlat        # (nlon,)
    gth = np.broadcast_to(th[None, :], (2 * nlat, nlat)).reshape(1, -1)
    gph = np.broadcast_to(ph[:, None], (2 * nlat, nlat)).reshape(1, -1)
    return jnp.asarray(np.ascontiguousarray(gth)), jnp.asarray(np.ascontiguousarray(gph))


def _dft_cos_matrix_t(nlon, mmax):
    # y = Ct @ x^T  with  Ct[m, n] = (2*pi/nlon) * cos(2*pi*n*m/nlon)
    # i.e. Re(2*pi*rfft(x, norm="forward"))[..., :mmax], transposed.
    m = np.arange(mmax)[:, None].astype(np.float64)
    n = np.arange(nlon)[None, :].astype(np.float64)
    Ct = (2.0 * np.pi / nlon) * np.cos(2.0 * np.pi * n * m / nlon)
    return jnp.asarray(Ct.astype(np.float32))


def _clenshaw_curtis(nlat):
    theta = np.pi * np.arange(nlat) / (nlat - 1)
    w = np.zeros(nlat)
    jmax = (nlat - 1) // 2
    for j in range(nlat):
        s = 0.0
        for b in range(1, jmax + 1):
            beta = 1.0 if 2 * b == (nlat - 1) else 2.0
            s += beta / (4.0 * b * b - 1.0) * math.cos(2.0 * b * theta[j])
        c = 1.0 if j in (0, nlat - 1) else 2.0
        w[j] = c / (nlat - 1) * (1.0 - s)
    return theta, w


def _sht_weights(mmax, lmax, nlat):
    # Orthonormal associated Legendre P_l^m(cos(theta)) (no Condon-Shortley
    # phase) x Clenshaw-Curtis quadrature weights, laid out (mmax, lmax, nlat)
    # so the in-kernel contraction reduces over the lane (nlat) axis.
    # TODO(synk): torch_harmonics applies its own normalization / csphase
    # conventions; constants here follow the standard orthonormal convention.
    theta, wq = _clenshaw_curtis(nlat)
    ct, st = np.cos(theta), np.sin(theta)
    nmax = max(mmax, lmax)
    p = np.zeros((nmax, nmax, nlat))
    p[0, 0] = 1.0 / math.sqrt(4.0 * math.pi)
    for m in range(1, nmax):
        p[m, m] = math.sqrt((2.0 * m + 1.0) / (2.0 * m)) * st * p[m - 1, m - 1]
    for m in range(nmax):
        for l in range(m + 1, nmax):
            a = math.sqrt((4.0 * l * l - 1.0) / (l * l - m * m))
            term = ct * p[m, l - 1]
            if l >= m + 2:
                b = math.sqrt(((l - 1.0) ** 2 - m * m) / (4.0 * (l - 1.0) ** 2 - 1.0))
                term = term - b * p[m, l - 2]
            p[m, l] = a * term
    pct = p[:mmax, :lmax, :] * wq[None, None, :]             # (mmax, lmax, nlat)
    # TODO(synk): casting these smooth constants (and Ct) to bfloat16 would
    # halve their VMEM and use the bf16-native MXU; kept f32 for parity with
    # the torch reference.
    return jnp.asarray(pct.astype(np.float32))


# ----------------------------------------------------------------------------
# Pallas kernel 1: kNN + gaussian weights + normalization + interpolation
# ----------------------------------------------------------------------------
def _knn_interp_kernel(gth_ref, gph_ref, tth_ref, tph_ref, feat_ref, out_ref,
                       *, k, inv_2s2):
    gth = gth_ref[...]                              # (1, TG) grid colatitude
    gph = gph_ref[...]                              # (1, TG) grid longitude
    # Targets arrive lane-major (1, P): dense DMA and ~128x less VMEM than
    # (P, 1) blocks.  One tiny lane->sublane transpose per grid step (O(P) XLU
    # work, negligible next to the k * (P, TG) loop below).
    tth = jnp.transpose(tth_ref[0], (1, 0))         # (P, 1) target colatitude
    tph = jnp.transpose(tph_ref[0], (1, 0))         # (P, 1) target longitude
    feat = jnp.transpose(feat_ref[0], (1, 0))       # (P, 1) target feature (radius)

    # squared euclidean distance in (theta, phi): (P, TG)
    d2 = (tth - gth) ** 2 + (tph - gph) ** 2
    feat_b = jnp.broadcast_to(feat, d2.shape)       # hoisted: JAX doesn't CSE broadcasts

    wsum = jnp.zeros((1, d2.shape[1]), jnp.float32)
    rsum = jnp.zeros((1, d2.shape[1]), jnp.float32)
    # Trimmed vectorized arg-k-min: per neighbor, one cross-sublane min (XLU),
    # one equality pass, one masked-gather pass (feat >= 0 so a 0-fill max is an
    # exact gather; rare-tie semantics), one invalidate pass.  Equivalent to
    # KeOps argKmin + gather + optional exp(-d/(2*s2)) + normalize + weighted sum.
    for _ in range(k):
        best_d = jnp.min(d2, axis=0, keepdims=True)                       # (1, TG)
        sel = d2 == best_d                                                # (P, TG)
        best_r = jnp.max(jnp.where(sel, feat_b, 0.0), axis=0, keepdims=True)
        # s_knn is None -> raw squared distance as weight (matches the torch ref).
        w = jnp.exp(-best_d * inv_2s2) if inv_2s2 is not None else best_d
        wsum = wsum + w
        rsum = rsum + w * best_r
        d2 = jnp.where(sel, jnp.inf, d2)            # exclude the selected point(s)
    # exact normalize: it is only a (1, TG) op, so the precise divide is ~free.
    out_ref[0] = rsum / wsum


def _pick_tile(ngrid_padded, npoint):
    # Largest lane tile that (a) divides the padded grid length and (b) keeps
    # ~5 live (P, TG) float32 temporaries of the k-loop inside the
    # generation-aware VMEM budget.
    p_pad = max(((int(npoint) + 7) // 8) * 8, 8)
    cap = max(TEMP_BUDGET // (p_pad * 4 * 5), 128)
    for tg in (2048, 1024, 512, 256, 128):
        if tg <= cap and ngrid_padded % tg == 0:
            return tg
    # TODO(synk): for P so large that even TG=128 overflows the budget (hit
    # earliest on v7x's 64 MiB VMEM), tile the P axis with a streaming k-best
    # merge instead of shrinking TG below 128 (~29% of HBM roofline).
    return 128


def knn_interpolate(grid_theta, grid_phi, t_theta, t_phi, feat, *, k, s2_knn):
    bs = t_theta.shape[0]
    P = t_theta.shape[-1]
    ngrid = grid_theta.shape[-1]
    ngrid_p = ((ngrid + 127) // 128) * 128          # pad so any nlat tiles cleanly
    if ngrid_p != ngrid:
        pad = ngrid_p - ngrid
        grid_theta = jnp.pad(grid_theta, ((0, 0), (0, pad)))
        grid_phi = jnp.pad(grid_phi, ((0, 0), (0, pad)))
    tg = _pick_tile(ngrid_p, P)
    inv_2s2 = None if s2_knn is None else 1.0 / (2.0 * float(s2_knn))
    kern = functools.partial(_knn_interp_kernel, k=k, inv_2s2=inv_2s2)
    out = pl.pallas_call(
        kern,
        out_shape=jax.ShapeDtypeStruct((bs, 1, ngrid_p), jnp.float32),
        grid=(bs, ngrid_p // tg),
        in_specs=[
            pl.BlockSpec((1, tg), lambda b, g: (0, g)),
            pl.BlockSpec((1, tg), lambda b, g: (0, g)),
            pl.BlockSpec((1, 1, P), lambda b, g: (b, 0, 0)),   # lane-major targets
            pl.BlockSpec((1, 1, P), lambda b, g: (b, 0, 0)),
            pl.BlockSpec((1, 1, P), lambda b, g: (b, 0, 0)),
        ],
        out_specs=pl.BlockSpec((1, 1, tg), lambda b, g: (b, 0, g)),
        compiler_params=pltpu.CompilerParams(
            dimension_semantics=("parallel", "parallel"),
            vmem_limit_bytes=VMEM_LIMIT),
    )(grid_theta, grid_phi, t_theta, t_phi, feat)
    return out[:, :, :ngrid]


# ----------------------------------------------------------------------------
# Pallas kernel 2: real spherical harmonic transform (real part only)
# ----------------------------------------------------------------------------
def _sht_kernel(xt_ref, ct_ref, wt_ref, o_ref):
    xT = xt_ref[0]                                                    # (nlon, nlat)
    # longitude DFT as ONE MXU matmul with nlat on the lane/N dim:
    #   y[m, t] = Re(2*pi*rfft(x[t, :], norm="forward"))[m]
    y = jnp.dot(ct_ref[...], xT, preferred_element_type=jnp.float32)  # (mmax, nlat)
    # Legendre / quadrature contraction over latitude, fused over all m:
    #   out[m, l] = sum_t y[m, t] * wt[m, l, t]
    # broadcast-multiply + lane reduction (VPU + XLU) -- no per-m M=1 matmuls,
    # no concatenate / relayout stores.
    o_ref[0] = jnp.sum(y[:, None, :] * wt_ref[...], axis=-1)


def sht_real(xT, dft_cos_t, wt):
    bs, nlon, nlat = xT.shape
    mmax, lmax, _ = wt.shape
    out_ml = pl.pallas_call(
        _sht_kernel,
        out_shape=jax.ShapeDtypeStruct((bs, mmax, lmax), jnp.float32),
        grid=(bs,),
        in_specs=[
            pl.BlockSpec((1, nlon, nlat), lambda b: (b, 0, 0)),
            # grid-invariant constants (constant index_map => no re-DMA per step).
            # TODO(synk): at realistic SHT sizes (nlat~mmax~lmax~180, wt~23 MiB)
            # single-buffer these (pipeline_mode=pl.Buffered(1)) or stream wt
            # over an m-tiling grid axis to fit v7x's 64 MiB VMEM.
            pl.BlockSpec((mmax, nlon), lambda b: (0, 0)),
            pl.BlockSpec((mmax, lmax, nlat), lambda b: (0, 0, 0)),
        ],
        out_specs=pl.BlockSpec((1, mmax, lmax), lambda b: (b, 0, 0)),
        compiler_params=pltpu.CompilerParams(
            dimension_semantics=("parallel",),
            vmem_limit_bytes=VMEM_LIMIT),
    )(xT, dft_cos_t, wt)
    return jnp.swapaxes(out_ml, 1, 2)               # tiny (bs,mmax,lmax) -> (bs,lmax,mmax)


# ----------------------------------------------------------------------------
# FreCalc.forward
# ----------------------------------------------------------------------------
def fre_calc_forward(target, *, nlat, nlon, lmax, mmax, k, s_knn,
                     distance="euclidean"):
    assert distance == "euclidean"
    assert nlon == 2 * nlat, "FreCalc grid construction implies nlon == 2*nlat"
    bs = target.shape[0]

    # to_spherical + the in-place "-pi" shift of the azimuth
    feat_r, sph = to_spherical(target)               # (B,1,P), (B,P,2)
    sph = sph.at[:, :, 1].add(-math.pi)

    # constants FreCalc.__init__ would precompute
    grid_theta, grid_phi = _make_grid_phi_major(nlat)    # (1, nlat*nlon) each
    dft_cos_t = _dft_cos_matrix_t(nlon, mmax)            # (mmax, nlon)
    wt = _sht_weights(mmax, lmax, nlat)                  # (mmax, lmax, nlat)
    s2_knn = float(s_knn) ** 2 if s_knn is not None else None

    # kernel 1: kNN search + weighting + normalization + interpolation
    t_theta = sph[:, :, 0][:, None, :]               # (B, 1, P) lane-major
    t_phi = sph[:, :, 1][:, None, :]                  # (B, 1, P)
    interp = knn_interpolate(grid_theta, grid_phi, t_theta, t_phi, feat_r,
                             k=k, s2_knn=s2_knn)      # (B, 1, nlat*nlon)
    # phi-major grid ordering => this reshape already yields the (bs, nlon, nlat)
    # layout kernel 2 consumes; no XLA transpose between the two pallas_calls.
    xT = interp.reshape(bs, nlon, nlat)

    # kernel 2: RealSHT(...).real
    return sht_real(xT, dft_cos_t, wt)                # (B, lmax, mmax)


if __name__ == "__main__":
    bs, npoint = 2, 8
    nlat, nlon = 16, 32        # FreCalc grid has nlat * 2*nlat == nlat*nlon points
    lmax = mmax = 8
    k = 5
    s_knn = 0.5                # euclidean -> s2_knn = s_knn**2

    key = jax.random.PRNGKey(0)
    target = jax.random.normal(key, (bs, npoint, 3), dtype=jnp.float32)

    out = fre_calc_forward(target, nlat=nlat, nlon=nlon, lmax=lmax, mmax=mmax,
                           k=k, s_knn=s_knn)
    out = jax.block_until_ready(out)
    assert out.shape == (bs, lmax, mmax) and out.dtype == jnp.float32
    print("KERNEL_OK")
</pallas_src>

<mosaic_0001>
module attributes {stable_mosaic.version = 11 : i64} {
  func.func @_knn_interp_kernel(%arg0: i32, %arg1: i32, %arg2: memref<1x512xf32, #tpu.memory_space<vmem>>, %arg3: memref<1x512xf32, #tpu.memory_space<vmem>>, %arg4: memref<1x1x8xf32, #tpu.memory_space<vmem>>, %arg5: memref<1x1x8xf32, #tpu.memory_space<vmem>>, %arg6: memref<1x1x8xf32, #tpu.memory_space<vmem>>, %arg7: memref<1x1x512xf32, #tpu.memory_space<vmem>>) attributes {dimension_semantics = [#tpu.dimension_semantics<parallel>, #tpu.dimension_semantics<parallel>], iteration_bounds = array<i64: 2, 1>, scalar_prefetch = 0 : i64, scratch_operands = 0 : i64, tpu.core_type = #tpu.core_type<tc>, window_params = [{transform_indices = @transform_0, window_bounds = array<i64: 1, 512>}, {transform_indices = @transform_1, window_bounds = array<i64: 1, 512>}, {transform_indices = @transform_2, window_bounds = array<i64: 1, 1, 8>}, {transform_indices = @transform_3, window_bounds = array<i64: 1, 1, 8>}, {transform_indices = @transform_4, window_bounds = array<i64: 1, 1, 8>}, {transform_indices = @transform_5, window_bounds = array<i64: 1, 1, 512>}]} {
    %c0 = arith.constant 0 : index
    %c0_0 = arith.constant 0 : index
    %0 = vector.load %arg2[%c0, %c0_0] : memref<1x512xf32, #tpu.memory_space<vmem>>, vector<1x512xf32>
    %c0_1 = arith.constant 0 : index
    %c0_2 = arith.constant 0 : index
    %1 = vector.load %arg3[%c0_1, %c0_2] : memref<1x512xf32, #tpu.memory_space<vmem>>, vector<1x512xf32>
    %c0_3 = arith.constant 0 : index
    %c0_4 = arith.constant 0 : index
    %c0_5 = arith.constant 0 : index
    %2 = vector.load %arg4[%c0_3, %c0_4, %c0_5] : memref<1x1x8xf32, #tpu.memory_space<vmem>>, vector<1x1x8xf32>
    %3 = vector.shape_cast %2 : vector<1x1x8xf32> to vector<1x8xf32>
    %4 = tpu.transpose %3, [1, 0] : vector<1x8xf32> -> vector<8x1xf32>
    %c0_6 = arith.constant 0 : index
    %c0_7 = arith.constant 0 : index
    %c0_8 = arith.constant 0 : index
    %5 = vector.load %arg5[%c0_6, %c0_7, %c0_8] : memref<1x1x8xf32, #tpu.memory_space<vmem>>, vector<1x1x8xf32>
    %6 = vector.shape_cast %5 : vector<1x1x8xf32> to vector<1x8xf32>
    %7 = tpu.transpose %6, [1, 0] : vector<1x8xf32> -> vector<8x1xf32>
    %c0_9 = arith.constant 0 : index
    %c0_10 = arith.constant 0 : index
    %c0_11 = arith.constant 0 : index
    %8 = vector.load %arg6[%c0_9, %c0_10, %c0_11] : memref<1x1x8xf32, #tpu.memory_space<vmem>>, vector<1x1x8xf32>
    %9 = vector.shape_cast %8 : vector<1x1x8xf32> to vector<1x8xf32>
    %10 = tpu.transpose %9, [1, 0] : vector<1x8xf32> -> vector<8x1xf32>
    %11 = vector.broadcast %4 : vector<8x1xf32> to vector<8x512xf32>
    %12 = vector.broadcast %0 : vector<1x512xf32> to vector<8x512xf32>
    %13 = arith.subf %11, %12 : vector<8x512xf32>
    %14 = arith.mulf %13, %13 : vector<8x512xf32>
    %15 = vector.broadcast %7 : vector<8x1xf32> to vector<8x512xf32>
    %16 = vector.broadcast %1 : vector<1x512xf32> to vector<8x512xf32>
    %17 = arith.subf %15, %16 : vector<8x512xf32>
    %18 = arith.mulf %17, %17 : vector<8x512xf32>
    %19 = arith.addf %14, %18 : vector<8x512xf32>
    %20 = vector.shape_cast %10 : vector<8x1xf32> to vector<8x1xf32>
    %21 = vector.broadcast %20 : vector<8x1xf32> to vector<8x512xf32>
    %cst = arith.constant 0.000000e+00 : f32
    %22 = vector.broadcast %cst : f32 to vector<1x512xf32>
    %cst_12 = arith.constant 0.000000e+00 : f32
    %23 = vector.broadcast %cst_12 : f32 to vector<1x512xf32>
    %cst_13 = arith.constant dense<0x7F800000> : vector<512xf32>
    %24 = vector.multi_reduction <minimumf>, %19, %cst_13 [0] : vector<8x512xf32> to vector<512xf32>
    %25 = vector.shape_cast %24 : vector<512xf32> to vector<1x512xf32>
    %26 = vector.broadcast %25 : vector<1x512xf32> to vector<8x512xf32>
    %27 = arith.cmpf oeq, %19, %26 : vector<8x512xf32>
    %cst_14 = arith.constant 0.000000e+00 : f32
    %28 = vector.broadcast %cst_14 : f32 to vector<8x512xf32>
    %29 = arith.select %27, %21, %28 : vector<8x512xi1>, vector<8x512xf32>
    %cst_15 = arith.constant dense<0xFF800000> : vector<512xf32>
    %30 = vector.multi_reduction <maximumf>, %29, %cst_15 [0] : vector<8x512xf32> to vector<512xf32>
    %31 = vector.shape_cast %30 : vector<512xf32> to vector<1x512xf32>
    %cst_16 = arith.constant 0.000000e+00 : f32
    %32 = vector.broadcast %cst_16 : f32 to vector<1x512xf32>
    %33 = arith.subf %32, %25 : vector<1x512xf32>
    %cst_17 = arith.constant 2.000000e+00 : f32
    %34 = vector.broadcast %cst_17 : f32 to vector<1x512xf32>
    %35 = arith.mulf %33, %34 : vector<1x512xf32>
    %36 = math.exp %35 : vector<1x512xf32>
    %37 = arith.addf %22, %36 : vector<1x512xf32>
    %38 = arith.mulf %36, %31 : vector<1x512xf32>
    %39 = arith.addf %23, %38 : vector<1x512xf32>
    %cst_18 = arith.constant 0x7F800000 : f32
    %40 = vector.broadcast %cst_18 : f32 to vector<8x512xf32>
    %41 = arith.select %27, %40, %19 : vector<8x512xi1>, vector<8x512xf32>
    %cst_19 = arith.constant dense<0x7F800000> : vector<512xf32>
    %42 = vector.multi_reduction <minimumf>, %41, %cst_19 [0] : vector<8x512xf32> to vector<512xf32>
    %43 = vector.shape_cast %42 : vector<512xf32> to vector<1x512xf32>
    %44 = vector.broadcast %43 : vector<1x512xf32> to vector<8x512xf32>
    %45 = arith.cmpf oeq, %41, %44 : vector<8x512xf32>
    %cst_20 = arith.constant 0.000000e+00 : f32
    %46 = vector.broadcast %cst_20 : f32 to vector<8x512xf32>
    %47 = arith.select %45, %21, %46 : vector<8x512xi1>, vector<8x512xf32>
    %cst_21 = arith.constant dense<0xFF800000> : vector<512xf32>
    %48 = vector.multi_reduction <maximumf>, %47, %cst_21 [0] : vector<8x512xf32> to vector<512xf32>
    %49 = vector.shape_cast %48 : vector<512xf32> to vector<1x512xf32>
    %cst_22 = arith.constant 0.000000e+00 : f32
    %50 = vector.broadcast %cst_22 : f32 to vector<1x512xf32>
    %51 = arith.subf %50, %43 : vector<1x512xf32>
    %cst_23 = arith.constant 2.000000e+00 : f32
    %52 = vector.broadcast %cst_23 : f32 to vector<1x512xf32>
    %53 = arith.mulf %51, %52 : vector<1x512xf32>
    %54 = math.exp %53 : vector<1x512xf32>
    %55 = arith.addf %37, %54 : vector<1x512xf32>
    %56 = arith.mulf %54, %49 : vector<1x512xf32>
    %57 = arith.addf %39, %56 : vector<1x512xf32>
    %cst_24 = arith.constant 0x7F800000 : f32
    %58 = vector.broadcast %cst_24 : f32 to vector<8x512xf32>
    %59 = arith.select %45, %58, %41 : vector<8x512xi1>, vector<8x512xf32>
    %cst_25 = arith.constant dense<0x7F800000> : vector<512xf32>
    %60 = vector.multi_reduction <minimumf>, %59, %cst_25 [0] : vector<8x512xf32> to vector<512xf32>
    %61 = vector.shape_cast %60 : vector<512xf32> to vector<1x512xf32>
    %62 = vector.broadcast %61 : vector<1x512xf32> to vector<8x512xf32>
    %63 = arith.cmpf oeq, %59, %62 : vector<8x512xf32>
    %cst_26 = arith.constant 0.000000e+00 : f32
    %64 = vector.broadcast %cst_26 : f32 to vector<8x512xf32>
    %65 = arith.select %63, %21, %64 : vector<8x512xi1>, vector<8x512xf32>
    %cst_27 = arith.constant dense<0xFF800000> : vector<512xf32>
    %66 = vector.multi_reduction <maximumf>, %65, %cst_27 [0] : vector<8x512xf32> to vector<512xf32>
    %67 = vector.shape_cast %66 : vector<512xf32> to vector<1x512xf32>
    %cst_28 = arith.constant 0.000000e+00 : f32
    %68 = vector.broadcast %cst_28 : f32 to vector<1x512xf32>
    %69 = arith.subf %68, %61 : vector<1x512xf32>
    %cst_29 = arith.constant 2.000000e+00 : f32
    %70 = vector.broadcast %cst_29 : f32 to vector<1x512xf32>
    %71 = arith.mulf %69, %70 : vector<1x512xf32>
    %72 = math.exp %71 : vector<1x512xf32>
    %73 = arith.addf %55, %72 : vector<1x512xf32>
    %74 = arith.mulf %72, %67 : vector<1x512xf32>
    %75 = arith.addf %57, %74 : vector<1x512xf32>
    %cst_30 = arith.constant 0x7F800000 : f32
    %76 = vector.broadcast %cst_30 : f32 to vector<8x512xf32>
    %77 = arith.select %63, %76, %59 : vector<8x512xi1>, vector<8x512xf32>
    %cst_31 = arith.constant dense<0x7F800000> : vector<512xf32>
    %78 = vector.multi_reduction <minimumf>, %77, %cst_31 [0] : vector<8x512xf32> to vector<512xf32>
    %79 = vector.shape_cast %78 : vector<512xf32> to vector<1x512xf32>
    %80 = vector.broadcast %79 : vector<1x512xf32> to vector<8x512xf32>
    %81 = arith.cmpf oeq, %77, %80 : vector<8x512xf32>
    %cst_32 = arith.constant 0.000000e+00 : f32
    %82 = vector.broadcast %cst_32 : f32 to vector<8x512xf32>
    %83 = arith.select %81, %21, %82 : vector<8x512xi1>, vector<8x512xf32>
    %cst_33 = arith.constant dense<0xFF800000> : vector<512xf32>
    %84 = vector.multi_reduction <maximumf>, %83, %cst_33 [0] : vector<8x512xf32> to vector<512xf32>
    %85 = vector.shape_cast %84 : vector<512xf32> to vector<1x512xf32>
    %cst_34 = arith.constant 0.000000e+00 : f32
    %86 = vector.broadcast %cst_34 : f32 to vector<1x512xf32>
    %87 = arith.subf %86, %79 : vector<1x512xf32>
    %cst_35 = arith.constant 2.000000e+00 : f32
    %88 = vector.broadcast %cst_35 : f32 to vector<1x512xf32>
    %89 = arith.mulf %87, %88 : vector<1x512xf32>
    %90 = math.exp %89 : vector<1x512xf32>
    %91 = arith.addf %73, %90 : vector<1x512xf32>
    %92 = arith.mulf %90, %85 : vector<1x512xf32>
    %93 = arith.addf %75, %92 : vector<1x512xf32>
    %cst_36 = arith.constant 0x7F800000 : f32
    %94 = vector.broadcast %cst_36 : f32 to vector<8x512xf32>
    %95 = arith.select %81, %94, %77 : vector<8x512xi1>, vector<8x512xf32>
    %cst_37 = arith.constant dense<0x7F800000> : vector<512xf32>
    %96 = vector.multi_reduction <minimumf>, %95, %cst_37 [0] : vector<8x512xf32> to vector<512xf32>
    %97 = vector.shape_cast %96 : vector<512xf32> to vector<1x512xf32>
    %98 = vector.broadcast %97 : vector<1x512xf32> to vector<8x512xf32>
    %99 = arith.cmpf oeq, %95, %98 : vector<8x512xf32>
    %cst_38 = arith.constant 0.000000e+00 : f32
    %100 = vector.broadcast %cst_38 : f32 to vector<8x512xf32>
    %101 = arith.select %99, %21, %100 : vector<8x512xi1>, vector<8x512xf32>
    %cst_39 = arith.constant dense<0xFF800000> : vector<512xf32>
    %102 = vector.multi_reduction <maximumf>, %101, %cst_39 [0] : vector<8x512xf32> to vector<512xf32>
    %103 = vector.shape_cast %102 : vector<512xf32> to vector<1x512xf32>
    %cst_40 = arith.constant 0.000000e+00 : f32
    %104 = vector.broadcast %cst_40 : f32 to vector<1x512xf32>
    %105 = arith.subf %104, %97 : vector<1x512xf32>
    %cst_41 = arith.constant 2.000000e+00 : f32
    %106 = vector.broadcast %cst_41 : f32 to vector<1x512xf32>
    %107 = arith.mulf %105, %106 : vector<1x512xf32>
    %108 = math.exp %107 : vector<1x512xf32>
    %109 = arith.addf %91, %108 : vector<1x512xf32>
    %110 = arith.mulf %108, %103 : vector<1x512xf32>
    %111 = arith.addf %93, %110 : vector<1x512xf32>
    %112 = arith.divf %111, %109 : vector<1x512xf32>
    %c0_42 = arith.constant 0 : index
    %c0_43 = arith.constant 0 : index
    %c0_44 = arith.constant 0 : index
    %113 = vector.load %arg7[%c0_42, %c0_43, %c0_44] : memref<1x1x512xf32, #tpu.memory_space<vmem>>, vector<1x1x512xf32>
    %114 = vector.shape_cast %113 : vector<1x1x512xf32> to vector<1x512xf32>
    %115 = vector.shape_cast %112 : vector<1x512xf32> to vector<1x1x512xf32>
    tpu.vector_store %arg7[%c0_42, %c0_43, %c0_44], %115 {strides = array<i32>} : memref<1x1x512xf32, #tpu.memory_space<vmem>>, vector<1x1x512xf32>,
    return
  }
  func.func @transform_0(%arg0: i32, %arg1: i32) -> (i32, i32) {
    %c0_i32 = arith.constant 0 : i32
    %c0_i32_0 = arith.constant 0 : i32
    return %c0_i32, %arg1 : i32, i32
  }
  func.func @transform_1(%arg0: i32, %arg1: i32) -> (i32, i32) {
    %c0_i32 = arith.constant 0 : i32
    %c0_i32_0 = arith.constant 0 : i32
    return %c0_i32, %arg1 : i32, i32
  }
  func.func @transform_2(%arg0: i32, %arg1: i32) -> (i32, i32, i32) {
    %c0_i32 = arith.constant 0 : i32
    %c0_i32_0 = arith.constant 0 : i32
    %c0_i32_1 = arith.constant 0 : i32
    return %arg0, %c0_i32, %c0_i32_0 : i32, i32, i32
  }
  func.func @transform_3(%arg0: i32, %arg1: i32) -> (i32, i32, i32) {
    %c0_i32 = arith.constant 0 : i32
    %c0_i32_0 = arith.constant 0 : i32
    %c0_i32_1 = arith.constant 0 : i32
    return %arg0, %c0_i32, %c0_i32_0 : i32, i32, i32
  }
  func.func @transform_4(%arg0: i32, %arg1: i32) -> (i32, i32, i32) {
    %c0_i32 = arith.constant 0 : i32
    %c0_i32_0 = arith.constant 0 : i32
    %c0_i32_1 = arith.constant 0 : i32
    return %arg0, %c0_i32, %c0_i32_0 : i32, i32, i32
  }
  func.func @transform_5(%arg0: i32, %arg1: i32) -> (i32, i32, i32) {
    %c0_i32 = arith.constant 0 : i32
    %c0_i32_0 = arith.constant 0 : i32
    return %arg0, %c0_i32, %arg1 : i32, i32, i32
  }
}

</mosaic_0001>

<bundles_post_ra>
// kernel: tpu_custom_call.1
= control target key start
LH: loop header
LB: loop body
LE: loop exit
PB: predicated region body
PF: predicated region fallthrough
CT: control target
= control target key end

     0   :  { %s2177_s0 = inlined_call_operand.hbm [shape: f32[1,512], index: 0, kind: input, shape index: {}]   ;;  %s2178_s1 = inlined_call_operand.hbm [shape: f32[1,512], index: 1, kind: input, shape index: {}]   ;;  %s2179_s2 = inlined_call_operand.hbm [shape: f32[2,1,8], index: 2, kind: input, shape index: {}]   ;;  %s2180_s3 = inlined_call_operand.vmem [shape: f32[2,1,8], index: 3, kind: input, shape index: {}]   ;;  %s2181_s4 = inlined_call_operand.hbm [shape: f32[2,1,8], index: 4, kind: input, shape index: {}]   ;;  %s2182_s5 = inlined_call_operand.hbm [shape: f32[2,1,512], index: 5, kind: output, shape index: {}]  }
   0x1   :  { %2187 = sst [smem:[#allocation20_spill]] %s2177_s0 }
   0x2   :  { %2188 = sst [smem:[#allocation21_spill]] %s2179_s2 }
   0x3   :  { %10 = vsyncpa [#allocation3], 0 }
   0x4   :  { %11 = vsyncpa [#allocation6], 0 }
   0x5   :  { %12 = vsyncpa [#allocation4], 0 }
   0x6   :  { %14 = vsyncpa [#allocation4 + $0x1], 0  ;;  %s1553_s18 = smov 0   ;;  %s1555_s19 = smov 0  }
   0x7   :  { %s1557_s20 = smov 0   ;;  %s1559_s21 = smov 0  }
   0x8   :  { %s1561_s22 = smov 0   ;;  %s1563_s23 = smov 0  }
   0x9 LB: > { %2189 = sst [smem:[#allocation14_spill]] %s1506_s20  ;;  %s1584_s24 = sadd.s32 4294967295, %s1518_s23   ;;  %s1518_s23 = sphi %s1563_s23, %s20_s23   ;;  %s1514_s22 = sphi %s1561_s22, %s2217_s22   ;;  %s1510_s21 = sphi %s1559_s21, %s2216_s21   ;;  %s1506_s20 = sphi %s1557_s20, %s2212_s20   ;;  %s1502_s19 = sphi %s1555_s19, %s2215_s19   ;;  %s1498_s18 = sphi %s1553_s18, %s2214_s18  }
   0xa   : > { %2190 = sst [smem:[#allocation15_spill]] %s1518_s23  ;;  %s1154_s25 = sadd.s32 4294967294, %s1518_s23  }
   0xb   : > { %p104_p0 = scmp.ne.s32.totalorder %s1502_s19, %s1498_s18  ;;  %p105_p1 = scmp.eq.s32.totalorder %s1584_s24, 0 }
   0xc   : > { %p182_p2 = scmp.eq.s32.totalorder %s1584_s24, 1  ;;  %p188_p3 = scmp.eq.s32.totalorder %s1154_s25, 1 }
   0xd   : > { %p1593_p4 = por %p105_p1, %p104_p0  ;;  %p1155_p5 = scmp.ge.s32.totalorder %s1518_s23, 1 }
   0xe   : > { %p1598_p6 = por %p188_p3, %p104_p0  ;;  %p195_p7 = scmp.lt.s32.totalorder %s1518_s23, 3 }
   0xf   : > { %s2193_s0 = sld [smem:[#allocation20_spill]]  ;;  %p1158_p9 = scmp.ge.s32.totalorder %s1518_s23, 2 }
  0x10   : > { %p1606_p8 = pnand %p1155_p5, %p195_p7  ;;  %s1520_s7 = smov [#allocation2]  }
  0x11   : > { %s211_s8 = sshll.u32 %s1520_s7, 4  ;;  %s32_s10 = sadd.s32 1, %s1514_s22  ;;  %s212_s8 = int_to_ptr.vmem [resolvable:$true] %s211_s8 }
  0x12   : > { %p1181_p10 = pneg %p1606_p8  ;;  %p34_p12 = scmp.ge.s32.totalorder %s32_s10, 2 }
  0x13   : > { %s91_s11 = sadd.s32 1, %s1506_s20  ;;  %p98_p13 = scmp.ne.s32.totalorder %s1506_s20, %s1502_s19 }
  0x14   : > { %p1615_p11 = pnand %p1181_p10, %p105_p1  ;;  %p99_p0 = scmp.eq.s32.totalorder %s1518_s23, 0 }
  0x15   : > { %s209_s30 = sshll.u32 %s2193_s0, 4  ;;  %s2219_s10 = smov (%p34_p12, %s32_s10), 0  ;;  %s210_s30 = int_to_ptr.hbm [resolvable:$true] %s209_s30 }
  0x16   : > { %1184 = dma.hbm_to_vmem [thread:$0]  (!%p1615_p11), %s210_s30, 64, %s212_s8, [#allocation3]  }
  0x17   : > { %2196 = sst [smem:[#allocation16_spill]] %s2219_s10  ;;  %p1628_p3 = por %p99_p0, %p98_p13 }
  0x18   : > { %p1634_p5 = por %p182_p2, %p98_p13  ;;  %s88_s14 = ssub.s32 %s1514_s22, %s2219_s10 }
  0x19   : > { %p1201_p7 = scmp.lt.s32.totalorder %s1518_s23, 2  ;;  %p89_p10 = scmp.eq.s32.totalorder %s88_s14, 0 }
  0x1a   : > { %s236_s15 = sand.u32 1, %s1518_s23   ;;  %s238_s16 = sand.u32 1, %s1506_s20  }
  0x1b   : > { %s1644_s17 = scalar_select %p89_p10, %s1506_s20, %s91_s11  }
  0x1c   : > { %s2200_s2 = sld [smem:[#allocation21_spill]]  ;;  %s239_s7 = scalar_lea.vmem [#allocation7], %s238_s16 }
  0x1d   : > { %2199 = sst [smem:[#allocation17_spill]] %s1644_s17  ;;  %s246_s8 = sshll.u32 %s239_s7, 4  ;;  %s247_s8 = int_to_ptr.vmem [resolvable:$true] %s246_s8 }
  0x1e   : > { %p1652_p2 = pnand %p1201_p7, %p1628_p3  ;;  %s223_s11 = sshll.u32 %s2178_s1, 4  ;;  %s224_s11 = int_to_ptr.hbm [resolvable:$true] %s223_s11 }
  0x1f   : > { %s1521_s25 = smov [#allocation5]   ;;  %s265_s7 = scalar_lea.hbm %s2181_s4, %s1514_s22 }
  0x20   : > { %s225_s28 = sshll.u32 %s1521_s25, 4  ;;  %s262_s17 = scalar_lea.vmem [#allocation8], %s238_s16  ;;  %s226_s28 = int_to_ptr.vmem [resolvable:$true] %s225_s28 }
  0x21   : > { %1187 = dma.hbm_to_vmem [thread:$0]  (!%p1615_p11), %s224_s11, 64, %s226_s28, [#allocation6]  }
  0x22   : > { %s242_s29 = scalar_lea.hbm %s2200_s2, %s1514_s22  ;;  %s237_s2 = scalar_lea.sflag [#allocation3], %s236_s15 }
  0x23   : > { %s244_s30 = sshll.u32 %s242_s29, 4  ;;  %s269_s20 = sshll.u32 %s262_s17, 4  ;;  %s245_s30 = int_to_ptr.hbm [resolvable:$true] %s244_s30  ;;  %s270_s20 = int_to_ptr.vmem [resolvable:$true] %s269_s20 }
  0x24   : > { %1191 = dma.hbm_to_vmem [thread:$0]  (!%p1652_p2), %s245_s30, 16, %s247_s8, %s237_s2  }
  0x25   : > { %s267_s23 = sshll.u32 %s265_s7, 4  ;;  %278 = sbr.rel (%p1606_p8) target bundleno = 480 (0x1e0), region = 40  ;;  %s268_s23 = int_to_ptr.hbm [resolvable:$true] %s267_s23 }
  0x26   : > { %1194 = dma.hbm_to_vmem [thread:$0]  (!%p1652_p2), %s268_s23, 16, %s270_s20, %s237_s2  }
  0x2a   : > { %1481 = dma.done.wait (%p105_p1), [#allocation3], 64  }
  0x2b   : > { %1483 = vsyncadd (%p105_p1), [#allocation3], 4294967232 }
  0x2c   : > { %1485 = dma.done.wait (%p105_p1), [#allocation6], 64  }
  0x2d   : > { %1487 = vsyncadd (%p105_p1), [#allocation6], 4294967232  ;;  %s290_s0 = sand.u32 1, %s1584_s24   ;;  %s1681_s2 = sand.u32 1, %s1502_s19  }
  0x2e   : > { %s291_s20 = scalar_lea.sflag [#allocation3], %s290_s0  ;;  %s293_s23 = scalar_lea.vmem [#allocation7], %s1681_s2 }
  0x2f   : > { %1489 = dma.done.wait (%p1593_p4), %s291_s20, 32  }
  0x30   : > { %1491 = vsyncadd (%p1593_p4), %s291_s20, 4294967264  ;;  %v1522_v0 = vmov 0   ;;  %p338_p1 = scmp.lt.s32.totalorder %s1510_s21, 1  ;;  %v344_v1 = vld [vmem:[%s293_s23] sm:$0x1]  ;;  %s302_s9 = scalar_lea.vmem [#allocation8], %s1681_s2 }
  0x31   : > { %1257 = vset.pattern.permute.xlu1 %v1522_v0  ;;  %v410_v2 = vld [vmem:[%s302_s9] sm:$0x1]  ;;  %345 = vxpose.xlu0.b32.start.end [1/1] (short) (narrow) %v344_v1, 8  ;;  %v343_v13 = vld [vmem:[#allocation5] sm:$0xf]  ;;  %s1162_s26 = sshll.u32 %s1681_s2, 2 }
  0x32   : > { %s339_s6 = scalar_select %p338_p1, %s1510_s21, 1  ;;  %411 = vxpose.xlu2.b32.start.end [1/1] (short) (narrow) %v410_v2, 8  ;;  %v342_v7 = vld [vmem:[#allocation2] sm:$0xf]  ;;  %v471_v14 = vperm.slane %v343_v13, 0  ;;  %v472_v15 = vperm.slane %v343_v13, 1 }
  0x33   : > { %v449_v9 = vperm.slane %v342_v7, 0  ;;  %v450_v10 = vperm.slane %v342_v7, 1  ;;  %v451_v11 = vperm.slane %v342_v7, 2  ;;  %v452_v12 = vperm.slane %v342_v7, 3  ;;  %s1164_s16 = sshll.u32 %s1510_s21, 2  ;;  %s335_s8 = scalar_lea.vmem [#allocation9], %s1162_s26 }
  0x34   : > { %s340_s15 = scalar_lea.vmem %s2180_s3, %s339_s6  ;;  %v473_v16 = vperm.slane %v343_v13, 2  ;;  %v474_v17 = vperm.slane %v343_v13, 3  ;;  %s1024_s30 = scalar_lea.hbm %s2182_s5, %s1164_s16 }
  0x35   : > { %v377_v3 = vld [vmem:[%s340_s15] sm:$0x1]  ;;  %s1026_s14 = sshll.u32 %s335_s8, 4  ;;  %s1028_s11 = sshll.u32 %s1024_s30, 4  ;;  %s1027_s14 = int_to_ptr.vmem [resolvable:$true] %s1026_s14  ;;  %s1029_s11 = int_to_ptr.hbm [resolvable:$true] %s1028_s11 }
  0x36   : > { %s1012_s25 = scalar_lea.sflag [#allocation4], %s1681_s2  ;;  %s1442_s28 = sshra.s32 %s1029_s11, 4  ;;  %s1443_s28 = int_to_ptr.hbm [resolvable:$true] %s1442_s28 }
  0x37   : > { %s1444_s12 = scalar_lea.hbm %s1443_s28, 4  ;;  %s1448_s0 = scalar_lea.hbm %s2182_s5, 8 }
  0x38   : > { %p1445_p4 = scmp.ne.s32.totalorder %s1443_s28, %s1444_s12  ;;  %p1449_p12 = scmp.lt.s32.totalorder %s1443_s28, %s2182_s5 }
  0x39   : > { %378 = vxpose.xlu0.b32.start.end [1/1] (short) (narrow) %v377_v3, 8  ;;  %p1450_p13 = scmp.lt.s32.totalorder %s1448_s0, %s1444_s12 }
  0x3a   : > { %p1446_p8 = pnand %p1445_p4, %p1634_p5 }
  0x3b   : > { %p1451_p0 = por %p1450_p13, %p1449_p12 }
  0x3c   : > { %p1447_p11 = pneg %p1446_p8 }
  0x3e   : > { %p1452_p3 = pnand %p1451_p0, %p1447_p11 }
  0x94   : > { %1258 = vset.pattern.permute.xlu2 %v1522_v0 }
  0xa0   : > { %1259 = vset.pattern.permute.xlu0 %v1522_v0 }
  0xcb   : > { %v427_v4 = vpop.trf.xlu2 }
  0xcc   : > { %493 = vperm.xlu2 %1258, %v427_v4  }
  0xd5   : > { %v361_v5 = vpop.trf.xlu0 }
  0xd6   : > { %445 = vperm.xlu1 %1257, %v361_v5  }
  0xdd   : > { %v394_v6 = vpop.trf.xlu0 }
  0xde   : > { %467 = vperm.xlu1 %1257, %v394_v6  }
 0x148   : > { %v446_v8 = vpop.permute.xlu1 %445 }
 0x149   : > { %v457_v18 = vsub.f32 %v446_v8, %v449_v9  ;;  %v458_v19 = vsub.f32 %v446_v8, %v450_v10  ;;  %v459_v20 = vsub.f32 %v446_v8, %v451_v11  ;;  %v460_v21 = vsub.f32 %v446_v8, %v452_v12 }
 0x14b   : > { %v461_v27 = vmul.f32 %v457_v18, %v457_v18  ;;  %v462_v28 = vmul.f32 %v458_v19, %v458_v19  ;;  %v463_v29 = vmul.f32 %v459_v20, %v459_v20  ;;  %v464_v30 = vmul.f32 %v460_v21, %v460_v21 }
 0x150   : > { %v468_v22 = vpop.permute.xlu1 %467 }
 0x151   : > { %v479_v23 = vsub.f32 %v468_v22, %v471_v14  ;;  %v480_v24 = vsub.f32 %v468_v22, %v472_v15  ;;  %v481_v25 = vsub.f32 %v468_v22, %v473_v16  ;;  %v482_v26 = vsub.f32 %v468_v22, %v474_v17 }
 0x153   : > { %v483_v31 = vmul.f32 %v479_v23, %v479_v23  ;;  %v484_v32 = vmul.f32 %v480_v24, %v480_v24  ;;  %v485_v33 = vmul.f32 %v481_v25, %v481_v25  ;;  %v486_v34 = vmul.f32 %v482_v26, %v482_v26 }
 0x155   : > { %v1694_v35 = vadd.f32 %v483_v31, %v461_v27  ;;  %v1696_v36 = vadd.f32 %v484_v32, %v462_v28  ;;  %v1698_v37 = vadd.f32 %v485_v33, %v463_v29  ;;  %v1700_v38 = vadd.f32 %v486_v34, %v464_v30 }
 0x157   : > { %v496_v39 = vrot.slane %v1694_v35, 4  ;;  %v502_v40 = vrot.slane %v1696_v36, 4  ;;  %v508_v41 = vrot.slane %v1698_v37, 4  ;;  %v514_v42 = vrot.slane %v1700_v38, 4 }
 0x159   : > { %v497_v43 = vmin.f32 %v1694_v35, %v496_v39  ;;  %v503_v44 = vmin.f32 %v1696_v36, %v502_v40  ;;  %v509_v45 = vmin.f32 %v1698_v37, %v508_v41  ;;  %v515_v46 = vmin.f32 %v1700_v38, %v514_v42 }
 0x15b   : > { %v498_v47 = vrot.slane %v497_v43, 2  ;;  %v504_v48 = vrot.slane %v503_v44, 2  ;;  %v510_v49 = vrot.slane %v509_v45, 2  ;;  %v516_v50 = vrot.slane %v515_v46, 2 }
 0x15d   : > { %v499_v51 = vmin.f32 %v497_v43, %v498_v47  ;;  %v505_v52 = vmin.f32 %v503_v44, %v504_v48  ;;  %v511_v53 = vmin.f32 %v509_v45, %v510_v49  ;;  %v517_v54 = vmin.f32 %v515_v46, %v516_v50 }
 0x15f   : > { %v500_v55 = vrot.slane %v499_v51, 1  ;;  %v506_v56 = vrot.slane %v505_v52, 1  ;;  %v512_v57 = vrot.slane %v511_v53, 1  ;;  %v518_v58 = vrot.slane %v517_v54, 1 }
 0x161   : > { %v1710_v59 = vmin.f32 %v499_v51, %v500_v55  ;;  %v1712_v60 = vmin.f32 %v505_v52, %v506_v56  ;;  %v1714_v61 = vmin.f32 %v511_v53, %v512_v57  ;;  %v1716_v62 = vmin.f32 %v517_v54, %v518_v58 }
 0x163   : > { %vm520_vm0 = vcmp.eq.f32.partialorder %v1694_v35, %v1710_v59  ;;  %vm521_vm1 = vcmp.eq.f32.partialorder %v1696_v36, %v1712_v60  ;;  %vm522_vm2 = vcmp.eq.f32.partialorder %v1698_v37, %v1714_v61  ;;  %vm523_vm3 = vcmp.eq.f32.partialorder %v1700_v38, %v1716_v62 }
 0x164   : > { %v1730_v63 = vsel %vm520_vm0, inf, %v1694_v35  ;;  %v1736_v0 = vsel %vm521_vm1, inf, %v1696_v36  ;;  %v1742_v1 = vsel %vm522_vm2, inf, %v1698_v37  ;;  %v1748_v2 = vsel %vm523_vm3, inf, %v1700_v38 }
 0x165   : > { %v584_v3 = vrot.slane %v1730_v63, 4  ;;  %v590_v4 = vrot.slane %v1736_v0, 4  ;;  %v596_v5 = vrot.slane %v1742_v1, 4  ;;  %v602_v6 = vrot.slane %v1748_v2, 4 }
 0x166   : > { %v552_v27 = vsub.f32 0.0, %v1710_v59  ;;  %v553_v28 = vsub.f32 0.0, %v1712_v60  ;;  %v554_v32 = vsub.f32 0.0, %v1714_v61  ;;  %v555_v41 = vsub.f32 0.0, %v1716_v62 }
 0x167   : > { %v585_v7 = vmin.f32 %v1730_v63, %v584_v3  ;;  %v591_v8 = vmin.f32 %v1736_v0, %v590_v4  ;;  %v597_v9 = vmin.f32 %v1742_v1, %v596_v5  ;;  %v603_v10 = vmin.f32 %v1748_v2, %v602_v6  ;;  %v1810_v3 = vpop.permute.xlu2 %493 }
 0x168   : > { %v556_v42 = vmul.f32 2.0, %v552_v27  ;;  %v557_v43 = vmul.f32 2.0, %v553_v28  ;;  %v558_v47 = vmul.f32 2.0, %v554_v32  ;;  %v559_v52 = vmul.f32 2.0, %v555_v41 }
 0x169   : > { %v586_v11 = vrot.slane %v585_v7, 2  ;;  %v592_v12 = vrot.slane %v591_v8, 2  ;;  %v598_v13 = vrot.slane %v597_v9, 2  ;;  %v604_v14 = vrot.slane %v603_v10, 2 }
 0x16a   : > { %v560_v53 = vmul.f32 1.442695, %v556_v42  ;;  %v562_v55 = vmul.f32 1.442695, %v557_v43  ;;  %v564_v4 = vmul.f32 1.442695, %v558_v47 }
 0x16b   : > { %v587_v15 = vmin.f32 %v585_v7, %v586_v11  ;;  %v593_v16 = vmin.f32 %v591_v8, %v592_v12  ;;  %v599_v17 = vmin.f32 %v597_v9, %v598_v13  ;;  %v605_v18 = vmin.f32 %v603_v10, %v604_v14 }
 0x16c   : > { %1260 = vpow2.f32 %v560_v53  ;;  %v566_v9 = vmul.f32 1.442695, %v559_v52  ;;  %v524_v11 = vsel %vm520_vm0, %v1810_v3, 0.0  ;;  %v526_v35 = vsel %vm522_vm2, %v1810_v3, 0.0 }
 0x16d   : > { %v588_v19 = vrot.slane %v587_v15, 1  ;;  %v594_v20 = vrot.slane %v593_v16, 1  ;;  %v600_v21 = vrot.slane %v599_v17, 1  ;;  %v606_v22 = vrot.slane %v605_v18, 1 }
 0x16e   : > { %1262 = vpow2.f32 %v562_v55  ;;  %v527_v36 = vsel %vm523_vm3, %v1810_v3, 0.0  ;;  %v528_v37 = vrot.slane %v524_v11, 4 }
 0x16f   : > { %v1758_v23 = vmin.f32 %v587_v15, %v588_v19  ;;  %v1760_v24 = vmin.f32 %v593_v16, %v594_v20  ;;  %v1762_v25 = vmin.f32 %v599_v17, %v600_v21  ;;  %v1764_v26 = vmin.f32 %v605_v18, %v606_v22 }
 0x170   : > { %1264 = vpow2.f32 %v564_v4  ;;  %v525_v16 = vsel %vm521_vm1, %v1810_v3, 0.0  ;;  %v540_v21 = vrot.slane %v526_v35, 4  ;;  %v529_v42 = vmax.f32 %v524_v11, %v528_v37 }
 0x171   : > { %vm608_vm4 = vcmp.eq.f32.partialorder %v1730_v63, %v1758_v23  ;;  %vm609_vm5 = vcmp.eq.f32.partialorder %v1736_v0, %v1760_v24  ;;  %vm610_vm6 = vcmp.eq.f32.partialorder %v1742_v1, %v1762_v25  ;;  %vm611_vm7 = vcmp.eq.f32.partialorder %v1748_v2, %v1764_v26 }
 0x172   : > { %v1780_v29 = vsel %vm608_vm4, inf, %v1730_v63  ;;  %v1786_v30 = vsel %vm609_vm5, inf, %v1736_v0  ;;  %v1792_v31 = vsel %vm610_vm6, inf, %v1742_v1  ;;  %v1799_v33 = vsel %vm611_vm7, inf, %v1748_v2  ;;  %v1861_v18 = vpop.eup %1260 }
 0x173   : > { %v672_v34 = vrot.slane %v1780_v29, 4  ;;  %v678_v39 = vrot.slane %v1786_v30, 4  ;;  %v684_v40 = vrot.slane %v1792_v31, 4  ;;  %v690_v48 = vrot.slane %v1799_v33, 4 }
 0x174   : > { %1266 = vpow2.f32 %v566_v9  ;;  %v640_v59 = vsub.f32 0.0, %v1758_v23  ;;  %v534_v62 = vrot.slane %v525_v16, 4  ;;  %v641_v19 = vsub.f32 0.0, %v1760_v24  ;;  %v1867_v22 = vpop.eup %1262 }
 0x175   : > { %v673_v44 = vmin.f32 %v1780_v29, %v672_v34  ;;  %v679_v45 = vmin.f32 %v1786_v30, %v678_v39  ;;  %v685_v46 = vmin.f32 %v1792_v31, %v684_v40  ;;  %v691_v54 = vmin.f32 %v1799_v33, %v690_v48 }
 0x176   : > { %v642_v20 = vsub.f32 0.0, %v1762_v25  ;;  %v643_v27 = vsub.f32 0.0, %v1764_v26  ;;  %v1878_v39 = vpop.eup %1264  ;;  %v644_v40 = vmul.f32 2.0, %v640_v59  ;;  %v546_v43 = vrot.slane %v527_v36, 4 }
 0x177   : > { %v674_v49 = vrot.slane %v673_v44, 2  ;;  %v680_v50 = vrot.slane %v679_v45, 2  ;;  %v686_v51 = vrot.slane %v685_v46, 2  ;;  %v692_v5 = vrot.slane %v691_v54, 2 }
 0x178   : > { %v535_v47 = vmax.f32 %v525_v16, %v534_v62  ;;  %v541_v52 = vmax.f32 %v526_v35, %v540_v21  ;;  %v647_v53 = vmul.f32 2.0, %v643_v27  ;;  %v530_v4 = vrot.slane %v529_v42, 2 }
 0x179   : > { %v675_v56 = vmin.f32 %v673_v44, %v674_v49  ;;  %v681_v57 = vmin.f32 %v679_v45, %v680_v50  ;;  %v687_v58 = vmin.f32 %v685_v46, %v686_v51  ;;  %v693_v10 = vmin.f32 %v691_v54, %v692_v5 }
 0x17a   : > { %v1884_v48 = vpop.eup %1266  ;;  %v645_v49 = vmul.f32 2.0, %v641_v19  ;;  %v646_v50 = vmul.f32 2.0, %v642_v20  ;;  %v547_v5 = vmax.f32 %v527_v36, %v546_v43  ;;  %v536_v9 = vrot.slane %v535_v47, 2 }
 0x17b   : > { %v676_v6 = vrot.slane %v675_v56, 1  ;;  %v682_v7 = vrot.slane %v681_v57, 1  ;;  %v688_v8 = vrot.slane %v687_v58, 1  ;;  %v694_v15 = vrot.slane %v693_v10, 1 }
 0x17c   : > { %v652_v11 = vmul.f32 1.442695, %v646_v50  ;;  %v542_v16 = vrot.slane %v541_v52, 2  ;;  %v654_v59 = vmul.f32 1.442695, %v647_v53  ;;  %v531_v21 = vmax.f32 %v529_v42, %v530_v4 }
 0x17d   : > { %v1816_v12 = vmin.f32 %v675_v56, %v676_v6  ;;  %v1818_v13 = vmin.f32 %v681_v57, %v682_v7  ;;  %v1820_v14 = vmin.f32 %v687_v58, %v688_v8  ;;  %v1841_v60 = vmin.f32 %v693_v10, %v694_v15 }
 0x17e   : > { %v648_v57 = vmul.f32 1.442695, %v644_v40  ;;  %v650_v10 = vmul.f32 1.442695, %v645_v49  ;;  %v612_v43 = vsel %vm608_vm4, %v1810_v3, 0.0  ;;  %v532_v50 = vrot.slane %v531_v21, 1 }
 0x17f   : > { %vm696_vm8 = vcmp.eq.f32.partialorder %v1780_v29, %v1816_v12  ;;  %vm697_vm9 = vcmp.eq.f32.partialorder %v1786_v30, %v1818_v13  ;;  %vm698_vm10 = vcmp.eq.f32.partialorder %v1792_v31, %v1820_v14  ;;  %vm699_vm11 = vcmp.eq.f32.partialorder %v1799_v33, %v1841_v60 }
 0x180   : > { %v1847_v61 = vsel %vm696_vm8, inf, %v1780_v29  ;;  %v1853_v17 = vsel %vm697_vm9, inf, %v1786_v30  ;;  %v1859_v38 = vsel %vm698_vm10, inf, %v1792_v31  ;;  %v1874_v28 = vsel %vm699_vm11, inf, %v1799_v33 }
 0x181   : > { %v760_v32 = vrot.slane %v1847_v61, 4  ;;  %v766_v34 = vrot.slane %v1853_v17, 4  ;;  %v772_v41 = vrot.slane %v1859_v38, 4  ;;  %v778_v46 = vrot.slane %v1874_v28, 4 }
 0x182   : > { %1268 = vpow2.f32 %v648_v57  ;;  %v728_v19 = vsub.f32 0.0, %v1816_v12  ;;  %v729_v27 = vsub.f32 0.0, %v1818_v13  ;;  %v730_v40 = vsub.f32 0.0, %v1820_v14 }
 0x183   : > { %v761_v44 = vmin.f32 %v1847_v61, %v760_v32  ;;  %v767_v45 = vmin.f32 %v1853_v17, %v766_v34  ;;  %v773_v51 = vmin.f32 %v1859_v38, %v772_v41  ;;  %v779_v56 = vmin.f32 %v1874_v28, %v778_v46 }
 0x184   : > { %1270 = vpow2.f32 %v650_v10  ;;  %v613_v46 = vsel %vm609_vm5, %v1810_v3, 0.0  ;;  %v732_v49 = vmul.f32 2.0, %v728_v19  ;;  %v733_v53 = vmul.f32 2.0, %v729_v27 }
 0x185   : > { %v762_v54 = vrot.slane %v761_v44, 2  ;;  %v768_v55 = vrot.slane %v767_v45, 2  ;;  %v774_v58 = vrot.slane %v773_v51, 2  ;;  %v780_v8 = vrot.slane %v779_v56, 2 }
 0x186   : > { %1272 = vpow2.f32 %v652_v11  ;;  %v616_v63 = vrot.slane %v612_v43, 4  ;;  %v622_v0 = vrot.slane %v613_v46, 4  ;;  %v736_v57 = vmul.f32 1.442695, %v732_v49 }
 0x187   : > { %v763_v6 = vmin.f32 %v761_v44, %v762_v54  ;;  %v769_v7 = vmin.f32 %v767_v45, %v768_v55  ;;  %v775_v15 = vmin.f32 %v773_v51, %v774_v58  ;;  %v781_v62 = vmin.f32 %v779_v56, %v780_v8 }
 0x188   : > { %v731_v44 = vsub.f32 0.0, %v1841_v60  ;;  %v537_v45 = vmax.f32 %v535_v47, %v536_v9  ;;  %v548_v51 = vrot.slane %v547_v5, 2  ;;  %v1912_v23 = vpop.eup %1268  ;;  %1274 = vpow2.f32 %v654_v59 }
 0x189   : > { %v764_v37 = vrot.slane %v763_v6, 1  ;;  %v770_v35 = vrot.slane %v769_v7, 1  ;;  %v776_v20 = vrot.slane %v775_v15, 1  ;;  %v782_v34 = vrot.slane %v781_v62, 1 }
 0x18a   : > { %v734_v47 = vmul.f32 2.0, %v730_v40  ;;  %v735_v24 = vmul.f32 2.0, %v731_v44  ;;  %v538_v54 = vrot.slane %v537_v45, 1  ;;  %v543_v55 = vmax.f32 %v541_v52, %v542_v16  ;;  %v1918_v56 = vpop.eup %1270 }
 0x18b   : > { %v1890_v36 = vmin.f32 %v763_v6, %v764_v37  ;;  %v1892_v32 = vmin.f32 %v769_v7, %v770_v35  ;;  %v1895_v41 = vmin.f32 %v775_v15, %v776_v20  ;;  %v1902_v42 = vmin.f32 %v781_v62, %v782_v34 }
 0x18c   : > { %v614_v52 = vsel %vm610_vm6, %v1810_v3, 0.0  ;;  %v738_v6 = vmul.f32 1.442695, %v733_v53  ;;  %v549_v8 = vmax.f32 %v547_v5, %v548_v51  ;;  %v617_v9 = vmax.f32 %v612_v43, %v616_v63  ;;  %v1942_v10 = vpop.eup %1272 }
 0x18d   : > { %vm784_vm12 = vcmp.eq.f32.partialorder %v1847_v61, %v1890_v36  ;;  %vm785_vm13 = vcmp.eq.f32.partialorder %v1853_v17, %v1892_v32  ;;  %vm786_vm14 = vcmp.eq.f32.partialorder %v1859_v38, %v1895_v41  ;;  %vm787_vm15 = vcmp.eq.f32.partialorder %v1874_v28, %v1902_v42 }
 0x18e   : > { %v1924_v58 = vsel %vm784_vm12, inf, %v1847_v61  ;;  %v1930_v4 = vsel %vm785_vm13, inf, %v1853_v17  ;;  %v1940_v7 = vsel %vm786_vm14, inf, %v1859_v38  ;;  %v740_v11 = vmul.f32 1.442695, %v734_v47  ;;  %v1956_v35 = vpop.eup %1274 }
 0x18f   : > { %v1948_v15 = vsel %vm787_vm15, inf, %v1874_v28  ;;  %v615_v1 = vsel %vm611_vm7, %v1810_v3, 0.0  ;;  %v623_v25 = vmax.f32 %v613_v46, %v622_v0  ;;  %v742_v16 = vmul.f32 1.442695, %v735_v24 }
 0x190   : > { %v848_v59 = vrot.slane %v1924_v58, 4  ;;  %v854_v5 = vrot.slane %v1930_v4, 4  ;;  %v628_v37 = vrot.slane %v614_v52, 4  ;;  %1276 = vpow2.f32 %v736_v57 }
 0x191   : > { %v860_v62 = vrot.slane %v1940_v7, 4  ;;  %v533_v19 = vmax.f32 %v531_v21, %v532_v50  ;;  %v544_v20 = vrot.slane %v543_v55, 1  ;;  %1278 = vpow2.f32 %v738_v6 }
 0x192   : > { %v866_v27 = vrot.slane %v1948_v15, 4  ;;  %v618_v34 = vrot.slane %v617_v9, 2  ;;  %v634_v2 = vrot.slane %v615_v1, 4  ;;  %1280 = vpow2.f32 %v740_v11 }
 0x193   : > { %v539_v26 = vmax.f32 %v537_v45, %v538_v54  ;;  %v550_v40 = vrot.slane %v549_v8, 1  ;;  %v624_v43 = vrot.slane %v623_v25, 2  ;;  %1282 = vpow2.f32 %v742_v16 }
 0x194   : > { %v849_v44 = vmin.f32 %v1924_v58, %v848_v59  ;;  %v855_v46 = vmin.f32 %v1930_v4, %v854_v5  ;;  %v629_v49 = vmax.f32 %v614_v52, %v628_v37  ;;  %v861_v51 = vmin.f32 %v1940_v7, %v860_v62 }
 0x195   : > { %v867_v21 = vmin.f32 %v1948_v15, %v866_v27  ;;  %v545_v50 = vmax.f32 %v543_v55, %v544_v20  ;;  %v619_v53 = vmax.f32 %v617_v9, %v618_v34  ;;  %v635_v63 = vmax.f32 %v615_v1, %v634_v2 }
 0x196   : > { %v1964_v47 = vpop.eup %1276  ;;  %v656_v45 = vadd.f32 %v1912_v23, %v1861_v18  ;;  %v551_v0 = vmax.f32 %v549_v8, %v550_v40  ;;  %v1969_v24 = vmul.f32 %v1861_v18, %v533_v19  ;;  %v625_v54 = vmax.f32 %v623_v25, %v624_v43 }
 0x197   : > { %v1971_v57 = vpop.eup %1278  ;;  %v850_v52 = vrot.slane %v849_v44, 2  ;;  %v856_v6 = vrot.slane %v855_v46, 2  ;;  %v1974_v11 = vmul.f32 %v1867_v22, %v539_v26  ;;  %v630_v55 = vrot.slane %v629_v49, 2 }
 0x198   : > { %v1976_v9 = vpop.eup %1280  ;;  %v657_v1 = vadd.f32 %v1918_v56, %v1867_v22  ;;  %v658_v8 = vadd.f32 %v1942_v10, %v1878_v39  ;;  %v659_v18 = vadd.f32 %v1956_v35, %v1884_v48  ;;  %v862_v25 = vrot.slane %v861_v51, 2 }
 0x199   : > { %v1984_v16 = vpop.eup %1282  ;;  %v868_v59 = vrot.slane %v867_v21, 2  ;;  %v1987_v5 = vmul.f32 %v1878_v39, %v545_v50  ;;  %v620_v37 = vrot.slane %v619_v53, 1  ;;  %v636_v62 = vrot.slane %v635_v63, 2 }
 0x19a   : > { %v1990_v19 = vadd.f32 %v1964_v47, %v656_v45  ;;  %v1993_v22 = vadd.f32 %v1971_v57, %v657_v1  ;;  %v1996_v20 = vmul.f32 %v1884_v48, %v551_v0  ;;  %v626_v27 = vrot.slane %v625_v54, 1 }
 0x19b   : > { %v1999_v34 = vadd.f32 %v1976_v9, %v658_v8  ;;  %v851_v2 = vmin.f32 %v849_v44, %v850_v52  ;;  %v857_v26 = vmin.f32 %v855_v46, %v856_v6  ;;  %v631_v40 = vmax.f32 %v629_v49, %v630_v55 }
 0x19c   : > { %2202 = vst [vmem:[#allocation18_spill] sm:$0xff] %v1993_v22  ;;  %v2002_v39 = vadd.f32 %v1984_v16, %v659_v18  ;;  %v817_v43 = vsub.f32 0.0, %v1892_v32  ;;  %v818_v50 = vsub.f32 0.0, %v1895_v41  ;;  %v863_v45 = vmin.f32 %v861_v51, %v862_v25 }
 0x19d   : > { %2203 = vst [vmem:[#allocation19_spill] sm:$0xff] %v1996_v20  ;;  %v819_v1 = vsub.f32 0.0, %v1902_v42  ;;  %v869_v22 = vmin.f32 %v867_v21, %v868_v59  ;;  %v621_v48 = vmax.f32 %v619_v53, %v620_v37  ;;  %v637_v0 = vmax.f32 %v635_v63, %v636_v62 }
 0x19e   : > { %v627_v20 = vmax.f32 %v625_v54, %v626_v27  ;;  %v700_v44 = vsel %vm696_vm8, %v1810_v3, 0.0  ;;  %v701_v46 = vsel %vm697_vm9, %v1810_v3, 0.0  ;;  %v702_v49 = vsel %vm698_vm10, %v1810_v3, 0.0 }
 0x19f   : > { %v852_v51 = vrot.slane %v851_v2, 1  ;;  %v858_v21 = vrot.slane %v857_v26, 1  ;;  %v632_v53 = vrot.slane %v631_v40, 1  ;;  %v703_v63 = vsel %vm699_vm11, %v1810_v3, 0.0 }
 0x1a0   : > { %v816_v29 = vsub.f32 0.0, %v1890_v36  ;;  %v2024_v12 = vmul.f32 2.0, %v817_v43  ;;  %v2026_v54 = vmul.f32 2.0, %v818_v50  ;;  %v864_v30 = vrot.slane %v863_v45, 1 }
 0x1a1   : > { %v2028_v13 = vmul.f32 2.0, %v819_v1  ;;  %v704_v52 = vrot.slane %v700_v44, 4  ;;  %v710_v31 = vrot.slane %v701_v46, 4  ;;  %v716_v14 = vrot.slane %v702_v49, 4 }
 0x1a2   : > { %v870_v6 = vrot.slane %v869_v22, 1  ;;  %v638_v55 = vrot.slane %v637_v0, 1  ;;  %v660_v8 = vmul.f32 %v1912_v23, %v621_v48  ;;  %v722_v18 = vrot.slane %v703_v63, 4 }
 0x1a3   : > { %v853_v25 = vmin.f32 %v851_v2, %v852_v51  ;;  %v2031_v33 = vmin.f32 %v857_v26, %v858_v21  ;;  %v633_v60 = vmax.f32 %v631_v40, %v632_v53  ;;  %v661_v59 = vmul.f32 %v1918_v56, %v627_v20 }
 0x1a4   : > { %v865_v37 = vmin.f32 %v863_v45, %v864_v30  ;;  %v788_v62 = vsel %vm784_vm12, %v1810_v3, 0.0  ;;  %v789_v27 = vsel %vm785_vm13, %v1810_v3, 0.0  ;;  %v790_v23 = vsel %vm786_vm14, %v1810_v3, 0.0 }
 0x1a5   : > { %v705_v2 = vmax.f32 %v700_v44, %v704_v52  ;;  %v711_v26 = vmax.f32 %v701_v46, %v710_v31  ;;  %v717_v40 = vmax.f32 %v702_v49, %v716_v14  ;;  %v791_v56 = vsel %vm787_vm15, %v1810_v3, 0.0 }
 0x1a6   : > { %v871_v61 = vmin.f32 %v869_v22, %v870_v6  ;;  %v639_v36 = vmax.f32 %v637_v0, %v638_v55  ;;  %v2051_v20 = vadd.f32 %v660_v8, %v1969_v24  ;;  %v723_v17 = vmax.f32 %v703_v63, %v722_v18 }
 0x1a7   : > { %vm872_vm0 = vcmp.eq.f32.partialorder %v1924_v58, %v853_v25  ;;  %v2055_v32 = vadd.f32 %v661_v59, %v1974_v11  ;;  %v792_v38 = vrot.slane %v788_v62, 4  ;;  %v798_v41 = vrot.slane %v789_v27, 4 }
 0x1a8   : > { %vm873_vm1 = vcmp.eq.f32.partialorder %v1930_v4, %v2031_v33  ;;  %v2060_v43 = vmul.f32 %v1942_v10, %v633_v60  ;;  %v804_v28 = vrot.slane %v790_v23, 4  ;;  %v810_v42 = vrot.slane %v791_v56, 4 }
 0x1a9   : > { %vm874_vm2 = vcmp.eq.f32.partialorder %v1940_v7, %v865_v37  ;;  %v706_v24 = vrot.slane %v705_v2, 2  ;;  %v712_v22 = vrot.slane %v711_v26, 2  ;;  %v718_v50 = vrot.slane %v717_v40, 2 }
 0x1aa   : > { %v2064_v58 = vmul.f32 %v1956_v35, %v639_v36  ;;  %v724_v11 = vrot.slane %v723_v17, 2  ;;  %v820_v45 = vmul.f32 2.0, %v816_v29  ;;  %v876_v1 = vsel %vm872_vm0, %v1810_v3, 0.0 }
 0x1ab   : > { %vm875_vm3 = vcmp.eq.f32.partialorder %v1948_v15, %v871_v61  ;;  %v793_v4 = vmax.f32 %v788_v62, %v792_v38  ;;  %v799_v48 = vmax.f32 %v789_v27, %v798_v41  ;;  %v877_v10 = vsel %vm873_vm1, %v1810_v3, 0.0 }
 0x1ac   : > { %v805_v0 = vmax.f32 %v790_v23, %v804_v28  ;;  %v811_v44 = vmax.f32 %v791_v56, %v810_v42  ;;  %v878_v7 = vsel %vm874_vm2, %v1810_v3, 0.0  ;;  %v904_v46 = vsub.f32 0.0, %v853_v25 }
 0x1ad   : > { %v707_v49 = vmax.f32 %v705_v2, %v706_v24  ;;  %v713_v51 = vmax.f32 %v711_v26, %v712_v22  ;;  %v719_v21 = vmax.f32 %v717_v40, %v718_v50  ;;  %v880_v35 = vrot.slane %v876_v1, 4 }
 0x1ae   : > { %v725_v53 = vmax.f32 %v723_v17, %v724_v11  ;;  %v824_v63 = vmul.f32 1.442695, %v820_v45  ;;  %v879_v29 = vsel %vm875_vm3, %v1810_v3, 0.0  ;;  %v886_v30 = vrot.slane %v877_v10, 4 }
 0x1af   : > { %v892_v52 = vrot.slane %v878_v7, 4  ;;  %v905_v15 = vsub.f32 0.0, %v2031_v33  ;;  %v906_v31 = vsub.f32 0.0, %v865_v37  ;;  %v908_v14 = vmul.f32 2.0, %v904_v46 }
 0x1b0   : > { %v794_v6 = vrot.slane %v793_v4, 2  ;;  %v800_v55 = vrot.slane %v799_v48, 2  ;;  %v826_v8 = vmul.f32 1.442695, %v2024_v12  ;;  %v907_v18 = vsub.f32 0.0, %v871_v61 }
 0x1b1   : > { %v806_v25 = vrot.slane %v805_v0, 2  ;;  %v812_v60 = vrot.slane %v811_v44, 2  ;;  %v828_v59 = vmul.f32 1.442695, %v2026_v54  ;;  %v881_v62 = vmax.f32 %v876_v1, %v880_v35 }
 0x1b2   : > { %1284 = vpow2.f32 %v824_v63  ;;  %v830_v27 = vmul.f32 1.442695, %v2028_v13  ;;  %v887_v3 = vmax.f32 %v877_v10, %v886_v30  ;;  %v898_v23 = vrot.slane %v879_v29, 4 }
 0x1b3   : > { %v893_v2 = vmax.f32 %v878_v7, %v892_v52  ;;  %v909_v26 = vmul.f32 2.0, %v905_v15  ;;  %v910_v33 = vmul.f32 2.0, %v906_v31  ;;  %v912_v37 = vmul.f32 1.442695, %v908_v14 }
 0x1b4   : > { %v708_v40 = vrot.slane %v707_v49, 1  ;;  %v714_v56 = vrot.slane %v713_v51, 1  ;;  %1286 = vpow2.f32 %v826_v8  ;;  %v911_v36 = vmul.f32 2.0, %v907_v18 }
 0x1b5   : > { %v720_v12 = vrot.slane %v719_v21, 1  ;;  %v795_v61 = vmax.f32 %v793_v4, %v794_v6  ;;  %1288 = vpow2.f32 %v828_v59  ;;  %v882_v17 = vrot.slane %v881_v62, 2 }
 0x1b6   : > { %v801_v38 = vmax.f32 %v799_v48, %v800_v55  ;;  %1290 = vpow2.f32 %v830_v27  ;;  %v888_v54 = vrot.slane %v887_v3, 2  ;;  %v899_v41 = vmax.f32 %v879_v29, %v898_v23  ;;  %v2204_v55 = vld [vmem:[#allocation18_spill] sm:$0xff] }
 0x1b7   : > { %v894_v28 = vrot.slane %v893_v2, 2  ;;  %1292 = vpow2.f32 %v912_v37  ;;  %v914_v13 = vmul.f32 1.442695, %v909_v26  ;;  %v916_v42 = vmul.f32 1.442695, %v910_v33 }
 0x1b8   : > { %v1285_v24 = vpop.eup %1284  ;;  %v726_v22 = vrot.slane %v725_v53, 1  ;;  %v807_v50 = vmax.f32 %v805_v0, %v806_v25  ;;  %v813_v11 = vmax.f32 %v811_v44, %v812_v60  ;;  %v918_v45 = vmul.f32 1.442695, %v911_v36 }
 0x1b9   : > { %v709_v1 = vmax.f32 %v707_v49, %v708_v40  ;;  %v715_v10 = vmax.f32 %v713_v51, %v714_v56  ;;  %v883_v7 = vmax.f32 %v881_v62, %v882_v17  ;;  %1294 = vpow2.f32 %v914_v13 }
 0x1ba   : > { %v1287_v4 = vpop.eup %1286  ;;  %v666_v48 = vadd.f32 %v2060_v43, %v1987_v5  ;;  %v889_v46 = vmax.f32 %v887_v3, %v888_v54  ;;  %v900_v35 = vrot.slane %v899_v41, 2  ;;  %1296 = vpow2.f32 %v916_v42 }
 0x1bb   : > { %v1289_v63 = vpop.eup %1288  ;;  %v796_v29 = vrot.slane %v795_v61, 1  ;;  %v802_v30 = vrot.slane %v801_v38, 1  ;;  %v895_v52 = vmax.f32 %v893_v2, %v894_v28  ;;  %1298 = vpow2.f32 %v918_v45 }
 0x1bc   : > { %v1291_v15 = vpop.eup %1290  ;;  %v721_v0 = vmax.f32 %v719_v21, %v720_v12  ;;  %v727_v44 = vmax.f32 %v725_v53, %v726_v22  ;;  %v808_v31 = vrot.slane %v807_v50, 1  ;;  %v832_v49 = vadd.f32 %v1285_v24, %v1990_v19  ;;  %v2205_v12 = vld [vmem:[#allocation19_spill] sm:$0xff] }
 0x1bd   : > { %v1293_v51 = vpop.eup %1292  ;;  %v748_v14 = vmul.f32 %v1964_v47, %v709_v1  ;;  %v749_v6 = vmul.f32 %v1971_v57, %v715_v10  ;;  %v814_v5 = vrot.slane %v813_v11, 1  ;;  %v884_v43 = vrot.slane %v883_v7, 1 }
 0x1be   : > { %v833_v8 = vadd.f32 %v1287_v4, %v2204_v55  ;;  %v890_v18 = vrot.slane %v889_v46, 1  ;;  %v901_v25 = vmax.f32 %v899_v41, %v900_v35  ;;  %v2081_v60 = vadd.f32 %v1293_v51, %v832_v49 }
 0x1bf   : > { %v1295_v59 = vpop.eup %1294  ;;  %v797_v62 = vmax.f32 %v795_v61, %v796_v29  ;;  %v803_v21 = vmax.f32 %v801_v38, %v802_v30  ;;  %v834_v53 = vadd.f32 %v1289_v63, %v1999_v34  ;;  %v896_v27 = vrot.slane %v895_v52, 1 }
 0x1c0   : > { %v1297_v19 = vpop.eup %1296  ;;  %v809_v3 = vmax.f32 %v807_v50, %v808_v31  ;;  %v835_v47 = vadd.f32 %v1291_v15, %v2002_v39  ;;  %v2085_v23 = vadd.f32 %v1295_v59, %v833_v8  ;;  %1300 = vrcp.f32 %v2081_v60 }
 0x1c1   : > { %v1299_v57 = vpop.eup %1298  ;;  %v750_v2 = vmul.f32 %v1976_v9, %v721_v0  ;;  %v815_v26 = vmax.f32 %v813_v11, %v814_v5  ;;  %v885_v33 = vmax.f32 %v883_v7, %v884_v43  ;;  %v2089_v37 = vadd.f32 %v1297_v19, %v834_v53 }
 0x1c2   : > { %v751_v40 = vmul.f32 %v1984_v16, %v727_v44  ;;  %v891_v56 = vmax.f32 %v889_v46, %v890_v18  ;;  %v902_v34 = vrot.slane %v901_v25, 1  ;;  %v2092_v36 = vadd.f32 %v1299_v57, %v835_v47 }
 0x1c3   : > { %v667_v39 = vadd.f32 %v2064_v58, %v2205_v12  ;;  %v836_v61 = vmul.f32 %v1285_v24, %v797_v62  ;;  %v897_v17 = vmax.f32 %v895_v52, %v896_v27  ;;  %1302 = vrcp.f32 %v2085_v23 }
 0x1c4   : > { %v752_v38 = vadd.f32 %v748_v14, %v2051_v20  ;;  %v753_v9 = vadd.f32 %v749_v6, %v2055_v32  ;;  %v837_v54 = vmul.f32 %v1287_v4, %v803_v21  ;;  %v838_v41 = vmul.f32 %v1289_v63, %v809_v3 }
 0x1c5   : > { %v754_v28 = vadd.f32 %v750_v2, %v666_v48  ;;  %v839_v13 = vmul.f32 %v1291_v15, %v815_v26  ;;  %v924_v16 = vmul.f32 %v1293_v51, %v885_v33  ;;  %1304 = vrcp.f32 %v2089_v37 }
 0x1c6   : > { %v1301_v42 = vpop.eup %1300  ;;  %v755_v22 = vadd.f32 %v751_v40, %v667_v39  ;;  %v903_v50 = vmax.f32 %v901_v25, %v902_v34  ;;  %v925_v11 = vmul.f32 %v1295_v59, %v891_v56  ;;  %1306 = vrcp.f32 %v2092_v36 }
 0x1c7   : > { %v840_v58 = vadd.f32 %v836_v61, %v752_v38  ;;  %v926_v24 = vmul.f32 %v1297_v19, %v897_v17  ;;  %v933_v45 = vmul.f32 %v1301_v42, %v2081_v60  ;;  %v941_v20 = vand.u32 2147483647, %v2081_v60 }
 0x1c8   : > { %v841_v32 = vadd.f32 %v837_v54, %v753_v9  ;;  %v842_v1 = vadd.f32 %v838_v41, %v754_v28  ;;  %v943_v10 = vand.u32 2147483648, %v2081_v60  ;;  %v843_v4 = vadd.f32 %v839_v13, %v755_v22 }
 0x1c9   : > { %v1303_v7 = vpop.eup %1302  ;;  %v928_v48 = vadd.f32 %v924_v16, %v840_v58  ;;  %v934_v46 = vsub.f32 1.0, %v933_v45  ;;  %v1006_v35 = vlaneseq  ;;  %v927_v63 = vmul.f32 %v1299_v57, %v903_v50 }
 0x1ca   : > { %v929_v29 = vadd.f32 %v925_v11, %v841_v32  ;;  %vm937_vm4 = vweird.f32 %v2081_v60  ;;  %v948_v30 = vmul.f32 %v1303_v7, %v2085_v23  ;;  %v930_v15 = vadd.f32 %v926_v24, %v842_v1 }
 0x1cb   : > { %v1305_v52 = vpop.eup %1304  ;;  %v935_v0 = vmul.f32 %v1301_v42, %v934_v46  ;;  %vm2106_vm5 = vcmp.eq.f32.partialorder %v941_v20, 8.507059e+37  ;;  %vm952_vm6 = vweird.f32 %v2085_v23  ;;  %vm938_vm7 = vweird.f32 %v1301_v42 }
 0x1cc   : > { %v1307_v31 = vpop.eup %1306  ;;  %v944_v49 = vor.u32 1.1754944e-38, %v943_v10  ;;  %v949_v51 = vsub.f32 1.0, %v948_v30  ;;  %v963_v14 = vmul.f32 %v1305_v52, %v2089_v37  ;;  %v956_v5 = vand.u32 2147483647, %v2085_v23  ;;  %vm2118_vm11 = vmor %vm937_vm4, %vm938_vm7 }
 0x1cd   : > { %v936_v6 = vadd.f32 %v1301_v42, %v935_v0  ;;  %v958_v43 = vand.u32 2147483648, %v2085_v23  ;;  %v978_v55 = vmul.f32 %v1307_v31, %v2092_v36  ;;  %vm999_vm8 = vcmask 1040384  }
 0x1ce   : > { %v950_v8 = vmul.f32 %v1303_v7, %v949_v51  ;;  %vm953_vm9 = vweird.f32 %v1303_v7  ;;  %v964_v18 = vsub.f32 1.0, %v963_v14  ;;  %vm967_vm10 = vweird.f32 %v2089_v37 }
 0x1cf   : > { %v971_v59 = vand.u32 2147483647, %v2089_v37  ;;  %v973_v62 = vand.u32 2147483648, %v2089_v37  ;;  %v979_v21 = vsub.f32 1.0, %v978_v55  ;;  %v988_v53 = vand.u32 2147483648, %v2092_v36  ;;  %vm954_vm13 = vmor %vm952_vm6, %vm953_vm9 }
 0x1d0   : > { %v940_v27 = vsel %vm2118_vm11, %v1301_v42, %v936_v6  ;;  %v951_v19 = vadd.f32 %v1303_v7, %v950_v8  ;;  %v965_v3 = vmul.f32 %v1305_v52, %v964_v18  ;;  %vm968_vm12 = vweird.f32 %v1305_v52 }
 0x1d1   : > { %v959_v60 = vor.u32 1.1754944e-38, %v958_v43  ;;  %v980_v47 = vmul.f32 %v1307_v31, %v979_v21  ;;  %vm983_vm14 = vweird.f32 %v1307_v31  ;;  %v986_v57 = vand.u32 2147483647, %v2092_v36  ;;  %vm969_vm1 = vmor %vm967_vm10, %vm968_vm12 }
 0x1d2   : > { %v955_v2 = vsel %vm954_vm13, %v1303_v7, %v951_v19  ;;  %vm957_vm15 = vcmp.eq.f32.partialorder %v956_v5, 8.507059e+37  ;;  %v966_v26 = vadd.f32 %v1305_v52, %v965_v3  ;;  %vm982_vm0 = vweird.f32 %v2092_v36 }
 0x1d3   : > { %v945_v33 = vsel %vm2106_vm5, %v944_v49, %v940_v27  ;;  %v960_v40 = vsel %vm957_vm15, %v959_v60, %v955_v2  ;;  %v974_v23 = vor.u32 1.1754944e-38, %v973_v62  ;;  %v981_v56 = vadd.f32 %v1307_v31, %v980_v47  ;;  %vm984_vm3 = vmor %vm982_vm0, %vm983_vm14 }
 0x1d4   : > { %v961_v34 = vmul.f32 %v960_v40, %v929_v29  ;;  %v970_v12 = vsel %vm969_vm1, %v1305_v52, %v966_v26  ;;  %vm972_vm2 = vcmp.eq.f32.partialorder %v971_v59, 8.507059e+37  ;;  %v989_v39 = vor.u32 1.1754944e-38, %v988_v53 }
 0x1d5   : > { %v931_v61 = vadd.f32 %v927_v63, %v843_v4  ;;  %v975_v17 = vsel %vm972_vm2, %v974_v23, %v970_v12  ;;  %v985_v38 = vsel %vm984_vm3, %v1307_v31, %v981_v56  ;;  %vm987_vm4 = vcmp.eq.f32.partialorder %v986_v57, 8.507059e+37 }
 0x1d6   : > { %v946_v36 = vmul.f32 %v945_v33, %v928_v48  ;;  %v976_v9 = vmul.f32 %v975_v17, %v930_v15  ;;  %v990_v37 = vsel %vm987_vm4, %v989_v39, %v985_v38  ;;  %v996_v54 = vrot.slane %v961_v34, 7 }
 0x1d7   : > { %v991_v41 = vmul.f32 %v990_v37, %v931_v61  ;;  %vm1001_vm5 = vcmask 1042434   ;;  %vm1003_vm6 = vcmask 1041408   ;;  %vm1008_vm7 = vcmp.lt.s32.totalorder %v1006_v35, 512 }
 0x1d8   : > { %v997_v28 = vrot.slane %v976_v9, 6  ;;  %v1000_v13 = vsel %vm999_vm8, %v946_v36, %v996_v54 }
 0x1d9   : > { %v998_v16 = vrot.slane %v991_v41, 5 }
 0x1db   : > { %v1002_v42 = vsel %vm1001_vm5, %v997_v28, %v998_v16 }
 0x1dc   : > { %v1004_v22 = vsel %vm1003_vm6, %v1000_v13, %v1002_v42 }
 0x1dd   : > { %1010 = vst.msk [vmem:[%s335_s8] sm:$0xf] %vm1008_vm7, %v1004_v22 }
 0x1de   : > { %1455 = shalt.err (!%p1452_p3)
}
 0x1df   : > { %1179 = dma.vmem_to_hbm [thread:$0]  (%p1634_p5), %s1027_s14, 64, %s1029_s11, %s1012_s25  }
 0x1e0 PF: > { %s2210_s2 = sld [smem:[#allocation15_spill]]  ;;  %s1040_s6 = sand.u32 1, %s1498_s18  }
 0x1e1   : > { %p1196_p7 = pnand %p1158_p9, %p1598_p6  ;;  %s1041_s9 = scalar_lea.sflag [#allocation4], %s1040_s6 }
 0x1e3   : > { %p1197_p10 = pneg %p1196_p7 }
 0x1e5   : > { %1493 = dma.done.wait (%p1197_p10), %s1041_s9, 64  }
 0x1e6   : > { %1495 = vsyncadd (%p1197_p10), %s1041_s9, 4294967232  ;;  %s20_s23 = sadd.s32 1, %s2210_s2   ;;  %s2211_s24 = sld [smem:[#allocation14_spill]] }
 0x1e7   : > { %p17_p2 = scmp.ge.s32.totalorder %s20_s23, 4   ;;  %s2212_s20 = sld [smem:[#allocation17_spill]] }
 0x1e8   : > { %s2213_s13 = sld [smem:[#allocation16_spill]]  ;;  %s2214_s18 = smov %s1502_s19 }
 0x1e9   : > { %s2216_s21 = smov %s1514_s22 }
 0x1ea   :  { %19 = sbr.rel (!%p17_p2) target bundleno = 9 (0x9), region = 108 }
 0x1ec   : > { %s2215_s19 = smov %s2211_s24 }
 0x1ee   : > { %s2217_s22 = smov %s2213_s13 }
 0x1ef   :  { %1047 = vsyncpa [#allocation3], 1 }
 0x1f0   :  { %1049 = vsyncpa [#allocation3 + $0x1], 1 }
 0x1f1   :  { %1050 = vsyncpa [#allocation6], 1 }
 0x1f2   :  { %1051 = vsyncpa [#allocation4], 1 }
 0x1f3   :  { %1053 = vsyncpa [#allocation4 + $0x1], 1 }

</bundles_post_ra>
